<compile_context>
chip_gen: v7x
topology: tpu7x:2x2x1
jax: 0.10.0
libtpu: 0.0.40
codegen_flags: <defaults>
</compile_context>

<pallas_src>
import functools
import math

import jax
import jax.numpy as jnp
from jax.experimental import pallas as pl
from jax.experimental.pallas import tpu as pltpu

LANE = 128            # lane width
SUBLANE_BF16 = 16     # rows per packed bf16 sublane tile
MAX_BATCH_TILE = 256  # batch-tile cap (keeps double-buffered VMEM footprint tiny)


# ----------------------------------------------------------------------------
# Padding helpers
# ----------------------------------------------------------------------------
def _round_up(n, m):
    return ((n + m - 1) // m) * m


def _pad_to(a, shape):
    pads = [(0, s - d) for d, s in zip(a.shape, shape)]
    return jnp.pad(a, pads)


def _batch_tiling(B):
    """Return (padded batch, batch tile).  grid = Bp // TB."""
    Bp = _round_up(max(B, SUBLANE_BF16), SUBLANE_BF16)
    if Bp <= MAX_BATCH_TILE:
        return Bp, Bp
    TB = MAX_BATCH_TILE
    return _round_up(B, TB), TB


# ----------------------------------------------------------------------------
# Kernels
# ----------------------------------------------------------------------------
def _linear_kernel(x_ref, w_ref, b_ref, o_ref):
    """o = dropout(x) @ W + b  (dropout == identity in eval mode)."""
    y = jnp.dot(x_ref[...], w_ref[...], preferred_element_type=jnp.float32)
    o_ref[...] = (y + b_ref[...]).astype(o_ref.dtype)


def _two_head_kernel(x_ref, w1_ref, b1_ref, w2a_ref, b2a_ref, w2b_ref, b2b_ref, o_ref):
    """Fused two-head MLP.

    h  = ReLU(x @ [W1a | W1b] + [b1a | b1b])          (one wide first matmul)
    o1 = h[:, :Hp]  @ W2a + b2a   -> lanes [0, Cap)
    o2 = h[:, Hp:]  @ W2b + b2b   -> lanes [Cap, Cap+Cbp)
    Both output writes are 128-lane aligned (unmasked stores).
    """
    Hp = w2a_ref.shape[0]
    Cap = w2a_ref.shape[1]
    h = jnp.dot(x_ref[...], w1_ref[...], preferred_element_type=jnp.float32)
    h = jnp.maximum(h + b1_ref[...], 0.0).astype(w2a_ref.dtype)  # back to bf16 for MXU
    y1 = jnp.dot(h[:, :Hp], w2a_ref[...], preferred_element_type=jnp.float32)
    y2 = jnp.dot(h[:, Hp:], w2b_ref[...], preferred_element_type=jnp.float32)
    o_ref[:, :Cap] = (y1 + b2a_ref[...]).astype(o_ref.dtype)
    o_ref[:, Cap:] = (y2 + b2b_ref[...]).astype(o_ref.dtype)


# ----------------------------------------------------------------------------
# Jitted forward wrappers (operate on pre-packed bf16 weights)
# ----------------------------------------------------------------------------
@functools.partial(jax.jit, static_argnames=("C",))
def _linear_forward(x, wp, bp, *, C):
    B, F = x.shape
    Cp = wp.shape[1]
    Bp, TB = _batch_tiling(B)
    xp = _pad_to(x, (Bp, F)).astype(jnp.bfloat16)

    out = pl.pallas_call(
        _linear_kernel,
        out_shape=jax.ShapeDtypeStruct((Bp, Cp), jnp.float32),
        grid=(Bp // TB,),
        in_specs=[
            pl.BlockSpec((TB, F), lambda i: (i, 0)),
            pl.BlockSpec((F, Cp), lambda i: (0, 0)),
            pl.BlockSpec((1, Cp), lambda i: (0, 0)),
        ],
        out_specs=pl.BlockSpec((TB, Cp), lambda i: (i, 0)),
        compiler_params=pltpu.CompilerParams(dimension_semantics=("parallel",)),
        cost_estimate=pl.CostEstimate(
            flops=2 * Bp * F * Cp,
            transcendentals=0,
            bytes_accessed=Bp * F * 2 + F * Cp * 2 + Cp * 4 + Bp * Cp * 4,
        ),
    )(xp, wp, bp)
    return out[:B, :C]


@functools.partial(jax.jit, static_argnames=("Ca", "Cb"))
def _two_head_forward(x, w1, b1, w2a, b2a, w2b, b2b, *, Ca, Cb):
    B, F = x.shape
    Hp2 = w1.shape[1]          # 2 * Hp (both heads' hidden, concatenated)
    Hp = Hp2 // 2
    Cap = w2a.shape[1]
    Cbp = w2b.shape[1]
    Bp, TB = _batch_tiling(B)
    xp = _pad_to(x, (Bp, F)).astype(jnp.bfloat16)

    flops = 2 * Bp * F * Hp2 + 2 * Bp * Hp * (Cap + Cbp)
    out = pl.pallas_call(
        _two_head_kernel,
        out_shape=jax.ShapeDtypeStruct((Bp, Cap + Cbp), jnp.float32),
        grid=(Bp // TB,),
        in_specs=[
            pl.BlockSpec((TB, F), lambda i: (i, 0)),
            pl.BlockSpec((F, Hp2), lambda i: (0, 0)),
            pl.BlockSpec((1, Hp2), lambda i: (0, 0)),
            pl.BlockSpec((Hp, Cap), lambda i: (0, 0)),
            pl.BlockSpec((1, Cap), lambda i: (0, 0)),
            pl.BlockSpec((Hp, Cbp), lambda i: (0, 0)),
            pl.BlockSpec((1, Cbp), lambda i: (0, 0)),
        ],
        out_specs=pl.BlockSpec((TB, Cap + Cbp), lambda i: (i, 0)),
        compiler_params=pltpu.CompilerParams(dimension_semantics=("parallel",)),
        cost_estimate=pl.CostEstimate(
            flops=flops,
            transcendentals=0,
            bytes_accessed=(Bp * F * 2 + F * Hp2 * 2 + Hp2 * 4
                            + Hp * (Cap + Cbp) * 2 + (Cap + Cbp) * 4
                            + Bp * (Cap + Cbp) * 4),
        ),
    )(xp, w1, b1, w2a, b2a, w2b, b2b)

    return out[:B, :Ca], out[:B, Cap:Cap + Cb]


# ----------------------------------------------------------------------------
# Parameter init (deterministic; mirrors nn.Linear default U(-1/sqrt(fan_in), ..))
# ----------------------------------------------------------------------------
def _init_linear(key, fan_in, fan_out, dtype=jnp.float32):
    kw, kb = jax.random.split(key)
    bound = 1.0 / math.sqrt(fan_in)
    w = jax.random.uniform(kw, (fan_in, fan_out), dtype, -bound, bound)  # stored [in, out]
    b = jax.random.uniform(kb, (1, fan_out), dtype, -bound, bound)
    return w, b


class ClassifierPallas:
    """JAX/Pallas port of the PyTorch `Classifier` module (eval-mode dropout).

    Weights are padded / packed / cast to bf16 once at construction time.
    """

    def __init__(self, in_features, C, isTwoHead=False, *, key):
        self.isTwoHead = isTwoHead
        if isTwoHead:
            k1, k2, k3, k4 = jax.random.split(key, 4)
            self.h1_w1, self.h1_b1 = _init_linear(k1, in_features, 200)
            self.h1_w2, self.h1_b2 = _init_linear(k2, 200, C[0])
            self.h2_w1, self.h2_b1 = _init_linear(k3, in_features, 200)
            self.h2_w2, self.h2_b2 = _init_linear(k4, 200, C[1])
            self.Ca, self.Cb = int(C[0]), int(C[1])

            H = 200
            Hp = _round_up(max(H, LANE), LANE)          # 200 -> 256 (MXU-tile aligned)
            Cap = _round_up(max(self.Ca, LANE), LANE)   # -> 128
            Cbp = _round_up(max(self.Cb, LANE), LANE)   # -> 128

            # First layer: both heads concatenated -> one wide matmul.
            self._w1 = jnp.concatenate(
                [_pad_to(self.h1_w1, (in_features, Hp)),
                 _pad_to(self.h2_w1, (in_features, Hp))], axis=1
            ).astype(jnp.bfloat16)                                   # [F, 2*Hp]
            self._b1 = jnp.concatenate(
                [_pad_to(self.h1_b1, (1, Hp)),
                 _pad_to(self.h2_b1, (1, Hp))], axis=1
            ).astype(jnp.float32)                                    # [1, 2*Hp]

            # Second layer: kept as two separate (dense, zero-free) weights.
            self._w2a = _pad_to(self.h1_w2, (Hp, Cap)).astype(jnp.bfloat16)
            self._b2a = _pad_to(self.h1_b2, (1, Cap)).astype(jnp.float32)
            self._w2b = _pad_to(self.h2_w2, (Hp, Cbp)).astype(jnp.bfloat16)
            self._b2b = _pad_to(self.h2_b2, (1, Cbp)).astype(jnp.float32)
        else:
            self.fc2_w, self.fc2_b = _init_linear(key, in_features, C)
            self.C = int(C)
            Cp = _round_up(max(self.C, LANE), LANE)
            self._w = _pad_to(self.fc2_w, (in_features, Cp)).astype(jnp.bfloat16)
            self._b = _pad_to(self.fc2_b, (1, Cp)).astype(jnp.float32)

    def __call__(self, x):
        if self.isTwoHead:
            return _two_head_forward(
                x, self._w1, self._b1, self._w2a, self._b2a, self._w2b, self._b2b,
                Ca=self.Ca, Cb=self.Cb,
            )
        else:
            return _linear_forward(x, self._w, self._b, C=self.C)


# ----------------------------------------------------------------------------
# Main
# ----------------------------------------------------------------------------
if __name__ == "__main__":
    key = jax.random.PRNGKey(0)
    k_x, k_p1, k_p2 = jax.random.split(key, 3)

    B, F = 4, 32                       # batch, in_features
    x = jax.random.normal(k_x, (B, F), jnp.float32)

    def bf(a):  # emulate the kernel's bf16 rounding for the reference
        return a.astype(jnp.bfloat16).astype(jnp.float32)

    hi = jax.lax.Precision.HIGHEST

    # --- single-head Classifier(in_features=32, C=10) ---
    clf = ClassifierPallas(F, 10, isTwoHead=False, key=k_p1)
    out = clf(x)
    jax.block_until_ready(out)
    ref = jnp.dot(bf(x), bf(clf.fc2_w), precision=hi) + clf.fc2_b
    assert out.shape == (B, 10)
    assert jnp.allclose(out, ref, atol=2e-2, rtol=2e-2)

    # --- two-head Classifier(in_features=32, C=(12, 6), isTwoHead=True) ---
    clf2 = ClassifierPallas(F, (12, 6), isTwoHead=True, key=k_p2)
    o1, o2 = clf2(x)
    jax.block_until_ready((o1, o2))

    h1 = jnp.maximum(jnp.dot(bf(x), bf(clf2.h1_w1), precision=hi) + clf2.h1_b1, 0.0)
    r1 = jnp.dot(bf(h1), bf(clf2.h1_w2), precision=hi) + clf2.h1_b2
    h2 = jnp.maximum(jnp.dot(bf(x), bf(clf2.h2_w1), precision=hi) + clf2.h2_b1, 0.0)
    r2 = jnp.dot(bf(h2), bf(clf2.h2_w2), precision=hi) + clf2.h2_b2

    assert o1.shape == (B, 12) and o2.shape == (B, 6)
    assert jnp.allclose(o1, r1, atol=2e-2, rtol=2e-2)
    assert jnp.allclose(o2, r2, atol=2e-2, rtol=2e-2)

    print("KERNEL_OK")
</pallas_src>

<mosaic_0001>
module attributes {stable_mosaic.version = 11 : i64} {
  func.func @_linear_kernel(%arg0: i32, %arg1: memref<16x32xbf16, #tpu.memory_space<vmem>>, %arg2: memref<32x128xbf16, #tpu.memory_space<vmem>>, %arg3: memref<1x128xf32, #tpu.memory_space<vmem>>, %arg4: memref<16x128xf32, #tpu.memory_space<vmem>>) attributes {dimension_semantics = [#tpu.dimension_semantics<parallel>], iteration_bounds = array<i64: 1>, scalar_prefetch = 0 : i64, scratch_operands = 0 : i64, tpu.core_type = #tpu.core_type<tc>, window_params = [{transform_indices = @transform_0, window_bounds = array<i64: 16, 32>}, {pipeline_mode = #tpu.pipeline_mode<synchronous>, transform_indices = @transform_1, window_bounds = array<i64: 32, 128>}, {pipeline_mode = #tpu.pipeline_mode<synchronous>, transform_indices = @transform_2, window_bounds = array<i64: 1, 128>}, {transform_indices = @transform_3, window_bounds = array<i64: 16, 128>}]} {
    %c0 = arith.constant 0 : index
    %c0_0 = arith.constant 0 : index
    %0 = vector.load %arg1[%c0, %c0_0] : memref<16x32xbf16, #tpu.memory_space<vmem>>, vector<16x32xbf16>
    %c0_1 = arith.constant 0 : index
    %c0_2 = arith.constant 0 : index
    %1 = vector.load %arg2[%c0_1, %c0_2] : memref<32x128xbf16, #tpu.memory_space<vmem>>, vector<32x128xbf16>
    %cst = arith.constant dense<0.000000e+00> : vector<16x128xf32>
    %2 = tpu.matmul %0, %1, %cst {dimension_numbers = #tpu.dot_dimension_numbers<[1], [0], [0], [1], [0, 0, 1, 1], [], []>} : vector<16x32xbf16>, vector<32x128xbf16>, vector<16x128xf32> -> vector<16x128xf32>
    %c0_3 = arith.constant 0 : index
    %c0_4 = arith.constant 0 : index
    %3 = vector.load %arg3[%c0_3, %c0_4] : memref<1x128xf32, #tpu.memory_space<vmem>>, vector<1x128xf32>
    %4 = vector.broadcast %3 : vector<1x128xf32> to vector<16x128xf32>
    %5 = arith.addf %2, %4 : vector<16x128xf32>
    %c0_5 = arith.constant 0 : index
    %c0_6 = arith.constant 0 : index
    %6 = vector.load %arg4[%c0_5, %c0_6] : memref<16x128xf32, #tpu.memory_space<vmem>>, vector<16x128xf32>
    tpu.vector_store %arg4[%c0_5, %c0_6], %5 {strides = array<i32>} : memref<16x128xf32, #tpu.memory_space<vmem>>, vector<16x128xf32>,
    return
  }
  func.func @transform_0(%arg0: i32) -> (i32, i32) {
    %c0_i32 = arith.constant 0 : i32
    %c0_i32_0 = arith.constant 0 : i32
    return %arg0, %c0_i32 : i32, i32
  }
  func.func @transform_1(%arg0: i32) -> (i32, i32) {
    %c0_i32 = arith.constant 0 : i32
    %c0_i32_0 = arith.constant 0 : i32
    %c0_i32_1 = arith.constant 0 : i32
    return %c0_i32, %c0_i32_0 : i32, i32
  }
  func.func @transform_2(%arg0: i32) -> (i32, i32) {
    %c0_i32 = arith.constant 0 : i32
    %c0_i32_0 = arith.constant 0 : i32
    %c0_i32_1 = arith.constant 0 : i32
    return %c0_i32, %c0_i32_0 : i32, i32
  }
  func.func @transform_3(%arg0: i32) -> (i32, i32) {
    %c0_i32 = arith.constant 0 : i32
    %c0_i32_0 = arith.constant 0 : i32
    return %arg0, %c0_i32 : i32, i32
  }
}

</mosaic_0001>

<bundles_post_ra>
// kernel: _linear_forward.1
= control target key start
LH: loop header
LB: loop body
LE: loop exit
PB: predicated region body
PF: predicated region fallthrough
CT: control target
= control target key end

     0   :  { %v117_v0 = vmov 0.0   ;;  %vm118_vm0 = vmmov 0   ;;  %vm45_vm1 = vcmask 261120   ;;  %s157_s1 = inlined_call_operand.vmem [shape: bf16[32,128], index: 1, kind: input, shape index: {}]   ;;  %s158_s0 = inlined_call_operand.vmem [shape: bf16[16,32], index: 0, kind: input, shape index: {}]   ;;  %s159_s2 = inlined_call_operand.vmem [shape: f32[1,128], index: 2, kind: input, shape index: {}]   ;;  %s160_s3 = inlined_call_operand.vmem [shape: f32[16,128], index: 3, kind: output, shape index: {}]  }
   0x1   :  { %104 = vmatprep.subr.bf16.mxu0 %v117_v0  ;;  %v114_v1 = vld [vmem:[%s157_s1] sm:$0xff]   ;;  %108 = vmatprep.mubr.msk.bf16.mxu0 %vm118_vm0, %v117_v0  ;;  %v115_v2 = vld [vmem:[%s157_s1 + $0x8] sm:$0xff]  }
   0x2   :  { %105 = vmatpush3.bf16.msra.mxu0 %v114_v1  ;;  %v116_v3 = vld [vmem:[%s158_s0] sm:$0xff]  }
   0x3   :  { %106 = vmatprep.subr.bf16.mxu0 %v117_v0  ;;  %v96_v4 = vld [vmem:[%s159_s2] ss:$0 sm:$0xff] }
   0x6   :  { %107 = vmatpush3.bf16.msra.mxu0 %v115_v2 }
   0x9   :  { %109 = vmatmul.mubr.msk.bf16.vlgmr.msra.gmra.mrb[0].mxu0 %vm45_vm1, %v116_v3 }
  0xdc   :  { %v83_v5 = vpop.f32.mrb[0].mxu0 }
  0xdd   :  { %v84_v6 = vadd.f32 %v96_v4, %v83_v5  ;;  %v110_v7 = vpop.f32.mrb[1].mxu0 }
  0xde   :  { %v86_v8 = vpop.f32.mrb[2].mxu0 }
  0xdf   :  { %90 = vst [vmem:[%s160_s3] sm:$0xff] %v84_v6  ;;  %v87_v9 = vadd.f32 %v96_v4, %v86_v8  ;;  %v111_v10 = vpop.f32.mrb[3].mxu0 }
  0xe1   :  { %91 = vst [vmem:[%s160_s3 + $0x8] sm:$0xff] %v87_v9 }

</bundles_post_ra>
